<compile_context>
chip_gen: v7x
topology: tpu7x:2x2x1
jax: 0.10.0
libtpu: 0.0.40
codegen_flags: <defaults>
</compile_context>

<pallas_src>
import functools

import jax
import jax.numpy as jnp
from jax import lax
from jax.experimental import pallas as pl
from jax.experimental.pallas import tpu as pltpu


def _round_up(x, m):
    return (x + m - 1) // m * m


def _linear_kernel(x_ref, w_ref, b_ref, o_ref):
    # x_ref: (TILE_B, D_in), w_ref: (D_out, D_in), b_ref: (1, D_out)
    # y = x @ W.T  ==  dot_general contracting last dim of both operands.
    acc = lax.dot_general(
        x_ref[...],
        w_ref[...],
        dimension_numbers=(((1,), (1,)), ((), ())),
        preferred_element_type=jnp.float32,
    )
    o_ref[...] = (acc + b_ref[...]).astype(o_ref.dtype)


@functools.partial(jax.jit, static_argnames=("tile_b",))
def net_m_forward(x, weight, bias, *, tile_b=512):
    """PyTorch nn.Linear semantics: y = x @ weight.T + bias.

    x: (B, D_in) f32, weight: (D_out, D_in) f32, bias: (D_out,) f32.
    """
    B, D_in = x.shape
    D_out = weight.shape[0]

    # Batch tile: full batch for tiny B (block == full dim is always legal),
    # otherwise a multiple of 8 (sublane-aligned) capped by the caller's hint.
    if tile_b >= B:
        tile_b = B
    else:
        tile_b = _round_up(tile_b, 8)
    grid = (pl.cdiv(B, tile_b),)

    # Bias as a (1, D_out) row so the in-kernel add broadcasts over the tile.
    bias2d = bias.reshape(1, D_out)

    # VMEM budget (bytes): single-buffered weight + double-buffered x / out
    # tiles (+ bias + headroom).  Keeps the kernel portable to v7x's 64 MiB.
    k_vmem = _round_up(D_in, 128)
    n_vmem = _round_up(D_out, 128)
    w_bytes = 4 * _round_up(D_out, 8) * k_vmem          # resident weight (x1)
    x_bytes = 2 * 4 * _round_up(tile_b, 8) * k_vmem     # pipelined x (x2)
    o_bytes = 2 * 4 * _round_up(tile_b, 8) * n_vmem     # pipelined out (x2)
    b_bytes = 4 * 8 * n_vmem                            # bias (x1)
    vmem_limit = min(max(w_bytes + x_bytes + o_bytes + b_bytes + (2 << 20),
                         32 << 20), 100 << 20)

    return pl.pallas_call(
        _linear_kernel,
        out_shape=jax.ShapeDtypeStruct((B, D_out), jnp.float32),
        grid_spec=pltpu.PrefetchScalarGridSpec(
            num_scalar_prefetch=0,
            grid=grid,
            in_specs=[
                # x: pipelined (double-buffered) along the batch grid axis.
                pl.BlockSpec((tile_b, D_in), lambda i: (i, 0)),
                # weight: grid-invariant -> VMEM-resident, single-buffered.
                pl.BlockSpec((D_out, D_in), lambda i: (0, 0),
                             pipeline_mode=pl.Buffered(1)),
                # bias: grid-invariant -> VMEM-resident, single-buffered.
                pl.BlockSpec((1, D_out), lambda i: (0, 0),
                             pipeline_mode=pl.Buffered(1)),
            ],
            out_specs=pl.BlockSpec((tile_b, D_out), lambda i: (i, 0)),
        ),
        compiler_params=pltpu.CompilerParams(
            dimension_semantics=("parallel",),
            vmem_limit_bytes=vmem_limit,
        ),
    )(x, weight, bias2d)


if __name__ == "__main__":
    # Small shapes consistent with Net_M(D_in, D_out): batch=8, D_in=100, D_out=64.
    B, D_IN, D_OUT = 8, 100, 64

    key = jax.random.PRNGKey(0)
    k_x, k_w, k_b = jax.random.split(key, 3)

    x = jax.random.normal(k_x, (B, D_IN), dtype=jnp.float32)
    weight = jax.random.normal(k_w, (D_OUT, D_IN), dtype=jnp.float32) * 0.1  # linear1.weight
    bias = jax.random.normal(k_b, (D_OUT,), dtype=jnp.float32) * 0.1         # linear1.bias

    out = net_m_forward(x, weight, bias)
    out = jax.block_until_ready(out)

    ref = x @ weight.T + bias
    assert out.shape == (B, D_OUT)
    assert jnp.allclose(out, ref, atol=1e-4, rtol=1e-4)

    print("KERNEL_OK")
</pallas_src>

<mosaic_0001>
module attributes {stable_mosaic.version = 11 : i64} {
  func.func @_linear_kernel(%arg0: i32, %arg1: memref<8x100xf32, #tpu.memory_space<vmem>>, %arg2: memref<64x100xf32, #tpu.memory_space<vmem>>, %arg3: memref<1x64xf32, #tpu.memory_space<vmem>>, %arg4: memref<8x64xf32, #tpu.memory_space<vmem>>) attributes {dimension_semantics = [#tpu.dimension_semantics<parallel>], iteration_bounds = array<i64: 1>, scalar_prefetch = 0 : i64, scratch_operands = 0 : i64, tpu.core_type = #tpu.core_type<tc>, window_params = [{transform_indices = @transform_0, window_bounds = array<i64: 8, 100>}, {pipeline_mode = #tpu.pipeline_mode<synchronous>, transform_indices = @transform_1, window_bounds = array<i64: 64, 100>}, {pipeline_mode = #tpu.pipeline_mode<synchronous>, transform_indices = @transform_2, window_bounds = array<i64: 1, 64>}, {transform_indices = @transform_3, window_bounds = array<i64: 8, 64>}]} {
    %c0 = arith.constant 0 : index
    %c0_0 = arith.constant 0 : index
    %0 = vector.load %arg1[%c0, %c0_0] : memref<8x100xf32, #tpu.memory_space<vmem>>, vector<8x100xf32>
    %c0_1 = arith.constant 0 : index
    %c0_2 = arith.constant 0 : index
    %1 = vector.load %arg2[%c0_1, %c0_2] : memref<64x100xf32, #tpu.memory_space<vmem>>, vector<64x100xf32>
    %cst = arith.constant dense<0.000000e+00> : vector<8x64xf32>
    %2 = tpu.matmul %0, %1, %cst {dimension_numbers = #tpu.dot_dimension_numbers<[1], [1], [0], [0], [0, 0, 1, 0], [], []>} : vector<8x100xf32>, vector<64x100xf32>, vector<8x64xf32> -> vector<8x64xf32>
    %c0_3 = arith.constant 0 : index
    %c0_4 = arith.constant 0 : index
    %3 = vector.load %arg3[%c0_3, %c0_4] : memref<1x64xf32, #tpu.memory_space<vmem>>, vector<1x64xf32>
    %4 = vector.broadcast %3 : vector<1x64xf32> to vector<8x64xf32>
    %5 = arith.addf %2, %4 : vector<8x64xf32>
    %c0_5 = arith.constant 0 : index
    %c0_6 = arith.constant 0 : index
    %6 = vector.load %arg4[%c0_5, %c0_6] : memref<8x64xf32, #tpu.memory_space<vmem>>, vector<8x64xf32>
    tpu.vector_store %arg4[%c0_5, %c0_6], %5 {strides = array<i32>} : memref<8x64xf32, #tpu.memory_space<vmem>>, vector<8x64xf32>,
    return
  }
  func.func @transform_0(%arg0: i32) -> (i32, i32) {
    %c0_i32 = arith.constant 0 : i32
    %c0_i32_0 = arith.constant 0 : i32
    return %arg0, %c0_i32 : i32, i32
  }
  func.func @transform_1(%arg0: i32) -> (i32, i32) {
    %c0_i32 = arith.constant 0 : i32
    %c0_i32_0 = arith.constant 0 : i32
    %c0_i32_1 = arith.constant 0 : i32
    return %c0_i32, %c0_i32_0 : i32, i32
  }
  func.func @transform_2(%arg0: i32) -> (i32, i32) {
    %c0_i32 = arith.constant 0 : i32
    %c0_i32_0 = arith.constant 0 : i32
    %c0_i32_1 = arith.constant 0 : i32
    return %c0_i32, %c0_i32_0 : i32, i32
  }
  func.func @transform_3(%arg0: i32) -> (i32, i32) {
    %c0_i32 = arith.constant 0 : i32
    %c0_i32_0 = arith.constant 0 : i32
    return %arg0, %c0_i32 : i32, i32
  }
}

</mosaic_0001>

<bundles_post_ra>
// kernel: net_m_forward.1
= control target key start
LH: loop header
LB: loop body
LE: loop exit
PB: predicated region body
PF: predicated region fallthrough
CT: control target
= control target key end

     0   :  { %8 = vsyncpa [#allocation3], 0  ;;  %s396_s0 = inlined_call_operand.hbm [shape: f32[8,100], index: 0, kind: input, shape index: {}]   ;;  %s397_s1 = inlined_call_operand.hbm [shape: f32[64,100], index: 1, kind: input, shape index: {}]   ;;  %s398_s2 = inlined_call_operand.vmem [shape: f32[1,64], index: 2, kind: input, shape index: {}]   ;;  %s399_s3 = inlined_call_operand.hbm [shape: f32[8,64], index: 3, kind: output, shape index: {}]  }
   0x1   :  { %9 = vsyncpa [#allocation6], 0 }
   0x2   :  { %10 = vsyncpa [#allocation4], 0  ;;  %s307_s12 = smov [#allocation2]   ;;  %s308_s14 = smov [#allocation5]  }
   0x3   :  { %s17_s13 = sshll.u32 %s307_s12, 4  ;;  %s26_s15 = sshll.u32 %s308_s14, 4  ;;  %s18_s13 = int_to_ptr.vmem [resolvable:$true] %s17_s13  ;;  %s335_s15 = int_to_ptr.vmem [resolvable:$true] %s26_s15 }
   0x4   :  { %s235_s18 = scalar_lea.hbm %s396_s0, 128 }
   0x5   :  { %p236_p0 = scmp.ne.s32.totalorder %s396_s0, %s235_s18  ;;  %p239_p1 = scmp.lt.u32.totalorder %s235_s18, %s396_s0 }
   0x7   :  { %p241_p2 = pnand %p239_p1, %p236_p0 }
   0x9   :  { %244 = shalt.err (!%p241_p2)
}
   0xa   :  { %s245_s23 = scalar_lea.vmem %s18_s13, 128  ;;  %p250_p4 = scmp.lt.s32.totalorder %s18_s13, %s18_s13 }
   0xb   :  { %p246_p3 = scmp.ne.s32.totalorder %s18_s13, %s245_s23  ;;  %p251_p5 = scmp.lt.s32.totalorder %s245_s23, %s245_s23 }
   0xd   :  { %p252_p6 = por %p251_p5, %p250_p4 }
   0xf   :  { %p253_p7 = pnand %p252_p6, %p246_p3 }
  0x11   :  { %256 = shalt.err (!%p253_p7)
}
  0x12   :  { %20 = dma.hbm_to_vmem [thread:$0]  %s396_s0, 128, %s18_s13, [#allocation3]  }
  0x13   :  { %s257_s28 = scalar_lea.hbm %s397_s1, 1024 }
  0x14   :  { %p258_p8 = scmp.ne.s32.totalorder %s397_s1, %s257_s28  ;;  %p261_p9 = scmp.lt.u32.totalorder %s257_s28, %s397_s1 }
  0x16   :  { %p263_p10 = pnand %p261_p9, %p258_p8 }
  0x18   :  { %266 = shalt.err (!%p263_p10)
}
  0x19   :  { %s267_s6 = scalar_lea.vmem %s335_s15, 1024  ;;  %p272_p12 = scmp.lt.s32.totalorder %s335_s15, %s335_s15 }
  0x1a   :  { %p268_p11 = scmp.ne.s32.totalorder %s335_s15, %s267_s6  ;;  %p273_p13 = scmp.lt.s32.totalorder %s267_s6, %s267_s6 }
  0x1c   :  { %p274_p0 = por %p273_p13, %p272_p12 }
  0x1e   :  { %p275_p1 = pnand %p274_p0, %p268_p11 }
  0x20   :  { %278 = shalt.err (!%p275_p1)
}
  0x21   :  { %s309_s0 = smov 128   ;;  %s310_s7 = smov 8  }
  0x22   :  { %32 = dma.hbm_to_vmem [thread:$0]  %s397_s1, 1024, %s335_s15, [#allocation6], %s309_s0, %s309_s0, %s310_s7  }
  0x23   :  { %301 = dma.done.wait [#allocation3], 128  }
  0x24   :  { %302 = vsyncadd [#allocation3], 4294967168 }
  0x25   :  { %303 = dma.done.wait [#allocation6], 1024  }
  0x26   :  { %304 = vsyncadd [#allocation6], 4294966272  ;;  %v311_v0 = vmov 0.0|0.0   ;;  %vm312_vm0 = vmmov 0   ;;  %v313_v1 = vmov 0.0   ;;  %vm57_vm1 = vcmask 818176  }
  0x27   :  { %211 = vmatprep.subr.bf16.mxu0 %v311_v0  ;;  %208 = vmatprep.mubr.msk.f32.mxu0 %vm312_vm0, %v313_v1  ;;  %v42_v2 = vld [vmem:[#allocation5] sm:$0xff]  ;;  %v43_v3 = vld [vmem:[#allocation5 + $0x8] sm:$0xff]  ;;  %vm368_vm2 = vmpackc.low %vm57_vm1, %vm57_vm1  ;;  %s314_s11 = smov [#allocation7]   ;;  %vm155_vm3 = vcmask 523264  }
  0x28   :  { %v212_v5 = vpack.c.bf16 %v43_v3, %v42_v2  ;;  %v44_v6 = vld [vmem:[#allocation5 + $0x10] sm:$0xff]  ;;  %v45_v7 = vld [vmem:[#allocation5 + $0x18] sm:$0xff]  ;;  %v46_v9 = vld [vmem:[#allocation5 + $0x20] sm:$0xff]  ;;  %s163_s12 = sshll.u32 %s314_s11, 4  ;;  %s164_s12 = int_to_ptr.vmem [resolvable:$true] %s163_s12 }
  0x29   :  { %v216_v8 = vpack.c.bf16 %v45_v7, %v44_v6  ;;  %v47_v10 = vld [vmem:[#allocation5 + $0x28] sm:$0xff]  ;;  %v48_v12 = vld [vmem:[#allocation5 + $0x30] sm:$0xff]  ;;  %v49_v13 = vld [vmem:[#allocation5 + $0x38] sm:$0xff]  ;;  %s279_s13 = scalar_lea.vmem %s164_s12, 128  ;;  %p284_p3 = scmp.lt.s32.totalorder %s164_s12, %s164_s12 }
  0x2a   :  { %214 = vmatpush3.bf16.xpose.msk.msra.mxu0 %vm368_vm2, %v212_v5  ;;  %v220_v11 = vpack.c.bf16 %v47_v10, %v46_v9  ;;  %v224_v14 = vpack.c.bf16 %v49_v13, %v48_v12  ;;  %v41_v15 = vld [vmem:[#allocation2] sm:$0xff]  ;;  %p280_p2 = scmp.ne.s32.totalorder %s164_s12, %s279_s13  ;;  %p285_p4 = scmp.lt.s32.totalorder %s279_s13, %s279_s13 }
  0x2b   :  { %215 = vmatprep.subr.bf16.mxu0 %v311_v0  ;;  %v173_v16 = vld [vmem:[%s398_s2] ss:$0 sm:$0xff] }
  0x2c   :  { %p286_p5 = por %p285_p4, %p284_p3 }
  0x2e   :  { %p287_p6 = pnand %p286_p5, %p280_p2 }
  0x32   :  { %218 = vmatpush3.bf16.xpose.msk.msra.mxu0 %vm368_vm2, %v216_v8 }
  0x33   :  { %219 = vmatprep.subr.bf16.mxu0 %v311_v0 }
  0x3a   :  { %222 = vmatpush3.bf16.xpose.msk.msra.mxu0 %vm368_vm2, %v220_v11 }
  0x3b   :  { %223 = vmatprep.subr.bf16.mxu0 %v311_v0 }
  0x42   :  { %226 = vmatpush3.bf16.xpose.msk.msra.mxu0 %vm368_vm2, %v224_v14 }
  0x49   :  { %209 = vmatmul.mubr.msk.f32.vlgmr.msra.gmra.mrb[0].mxu0 %vm57_vm1, %v41_v15 }
 0x11c   :  { %v151_v17 = vpop.f32.mrb[0].mxu0 }
 0x11d   :  { %v152_v18 = vadd.f32 %v173_v16, %v151_v17  ;;  %v210_v19 = vpop.f32.mrb[1].mxu0 }
 0x11f   :  { %156 = vst.msk [vmem:[#allocation7] sm:$0xff] %vm155_vm3, %v152_v18 }
 0x120   :  { %290 = shalt.err (!%p287_p6)
}
 0x121   :  { %s291_s16 = scalar_lea.hbm %s399_s3, 128 }
 0x122   :  { %p292_p7 = scmp.ne.s32.totalorder %s399_s3, %s291_s16  ;;  %p295_p8 = scmp.lt.u32.totalorder %s291_s16, %s399_s3 }
 0x124   :  { %p297_p9 = pnand %p295_p8, %p292_p7 }
 0x126   :  { %300 = shalt.err (!%p297_p9)
}
 0x127   :  { %166 = dma.vmem_to_hbm [thread:$0]  %s164_s12, 128, %s399_s3, [#allocation4]  }
 0x128   :  { %305 = dma.done.wait [#allocation4], 128  }
 0x129   :  { %306 = vsyncadd [#allocation4], 4294967168 }
 0x12a   :  { %170 = vsyncpa [#allocation3], 1 }
 0x12b   :  { %171 = vsyncpa [#allocation6], 1 }
 0x12c   :  { %172 = vsyncpa [#allocation4], 1 }

</bundles_post_ra>
